<compile_context>
chip_gen: v5e
topology: v5e:2x2
jax: 0.10.0
libtpu: 0.0.40
codegen_flags: <defaults>
</compile_context>

<pallas_src>
import functools

import jax
import jax.numpy as jnp
from jax.experimental import pallas as pl
from jax.experimental.pallas import tpu as pltpu


def _cdiv(a, b):
    return -(-a // b)


def _round_up(a, b):
    return _cdiv(a, b) * b


def _vmem_limit_bytes():
    """Scoped-VMEM limit derived from the current TPU generation."""
    try:
        cap = int(pltpu.get_tpu_info().vmem_capacity_bytes)
    except Exception:
        cap = 64 * 1024 * 1024  # conservative (v7x-sized) fallback
    # Leave headroom for compiler-internal scratch; never request above 96 MiB.
    return max(min(cap - 16 * 1024 * 1024, 96 * 1024 * 1024), 16 * 1024 * 1024)


def _pick_tile_n(n, s, d1, d2, c_max, c_out, batch, vmem_limit):
    """Largest lane-aligned N tile whose working set fits the VMEM budget."""
    n128 = _round_up(n, 128)
    budget = int(0.70 * vmem_limit)

    def vmem_need(t):
        streamed = 2 * 4 * (8 + d1 + c_out) * t      # double-buffered in/out blocks (f32)
        nn_tmp = 6 * 4 * s * t                        # d, dd, select temps, acc (f32)
        acts = 4 * t * (2 * c_max + d1 + d2)          # MLP activations + interp
        return streamed + nn_tmp + acts

    tile = 128
    for t in (1024, 512, 256, 128):
        if t <= n128 and vmem_need(t) <= budget:
            tile = t
            break
    # TODO(synk): if even TILE_N=128 exceeds the budget (very large S), the S
    # axis itself should be tiled; here we clamp to 128 and rely on headroom.

    # Keep at least two grid items when possible (v7x has 2 TensorCores).
    while tile > 128 and batch * _cdiv(n128, tile) < 2:
        tile //= 2
    return min(tile, n128)


# --------------------------------------------------------------------------
# Fused kernel: per (batch, N-tile)
#   d(S,TILE_N)   = one K=8 matmul of pre-augmented xyz arrays (= sq. distance)
#   3-NN inverse-distance weights -> acc(S,TILE_N), norm(1,TILE_N)
#   interp(D2,TILE_N) = (p2 @ acc) * 1/norm
#   h = relu(W0a @ p1 + W0b @ interp + shift0); remaining MLP layers (bf16 MXU)
# --------------------------------------------------------------------------
def _fea_propagate_kernel(xyz1a_ref, xyz2a_ref, pts2_ref, *rest,
                          has_p1, num_layers):
    out_ref = rest[-1]
    if has_p1:
        pts1_ref = rest[0]
        params = rest[1:-1]
    else:
        pts1_ref = None
        params = rest[:-1]

    tile_n = xyz1a_ref.shape[2]
    s = xyz2a_ref.shape[1]
    d2 = pts2_ref.shape[1]

    p2 = pts2_ref[0].astype(jnp.float32)                         # (D2, S)

    if s == 1:
        # S == 1: the single source point is broadcast to every query point.
        interp = jnp.broadcast_to(p2, (d2, tile_n))
    else:
        x1a = xyz1a_ref[0].astype(jnp.float32)                   # (8, TILE_N)
        x2a = xyz2a_ref[0].astype(jnp.float32)                   # (S, 8)
        # Squared pairwise distances straight out of one K=8 MXU pass
        # (same expanded form as square_distance; intentionally unclamped so
        # semantics match the PyTorch reference exactly).
        d = jnp.dot(x2a, x1a, preferred_element_type=jnp.float32)  # (S, TILE_N)

        # 3-NN inverse-distance weights: single unnormalized accumulator plus
        # a norm row; normalize after the matmul (EUP reciprocals, free slot).
        k_nn = min(3, s)
        dd = d
        acc = jnp.zeros((s, tile_n), jnp.float32)
        norm = jnp.zeros((1, tile_n), jnp.float32)
        for _ in range(k_nn):
            mk = jnp.min(dd, axis=0, keepdims=True)              # (1, TILE_N)
            sel = dd == mk                                       # (S, TILE_N)
            # (no index tie-break: differs from torch.sort only when two
            #  source distances are bit-identical)
            r = pl.reciprocal(mk + 1e-8, approx=True)            # (1, TILE_N)
            acc = acc + jnp.where(sel, r, 0.0)
            norm = norm + r
            dd = jnp.where(sel, 1e30, dd)

        interp = (jnp.dot(p2, acc, preferred_element_type=jnp.float32)
                  * pl.reciprocal(norm, approx=True))            # (D2, TILE_N)

    # Shared MLP (BN scale pre-folded): h <- relu(W @ h + shift), bf16 matmuls.
    pi = 0
    if has_p1:
        w0a = params[pi][...]                                    # (C0, D1) bf16
        pi += 1
    w0b = params[pi][...]                                        # (C0, D2) bf16
    shift0 = params[pi + 1][...]                                 # (C0, 1)  f32
    pi += 2

    h = jnp.dot(w0b, interp.astype(jnp.bfloat16),
                preferred_element_type=jnp.float32)              # (C0, TILE_N)
    if has_p1:
        p1 = pts1_ref[0].astype(jnp.bfloat16)                    # (D1, TILE_N)
        h = h + jnp.dot(w0a, p1, preferred_element_type=jnp.float32)
    h = jnp.maximum(h + shift0, 0.0)

    for _ in range(num_layers - 1):
        w = params[pi][...]                                      # bf16
        sh = params[pi + 1][...]                                 # f32
        pi += 2
        h = jnp.dot(w, h.astype(jnp.bfloat16),
                    preferred_element_type=jnp.float32)
        h = jnp.maximum(h + sh, 0.0)

    out_ref[0] = h.astype(out_ref.dtype)


# --------------------------------------------------------------------------
# Wrapper
# --------------------------------------------------------------------------
class FeaPropagate:
    """Inference-mode FeaPropagate with deterministically initialized params.

    Conv1d(k=1) + BatchNorm1d + ReLU is folded to `W' @ x + shift` with the BN
    scale folded into W'.
    """

    def __init__(self, in_channel, mlp, key):
        self.weights = []   # f32 masters: (C_out, C_in), BN scale folded in
        self.shifts = []    # (C_out, 1) folded BN shift (incl. conv bias)
        eps = 1e-5
        last = in_channel
        for out_ch in mlp:
            key, k1, k2, k3, k4 = jax.random.split(key, 5)
            w = jax.random.normal(k1, (out_ch, last), jnp.float32) * 0.1
            b = jax.random.normal(k2, (out_ch,), jnp.float32) * 0.1
            gamma = 1.0 + 0.1 * jax.random.normal(k3, (out_ch,), jnp.float32)
            beta = 0.1 * jax.random.normal(k4, (out_ch,), jnp.float32)
            run_mean = jnp.zeros((out_ch,), jnp.float32)
            run_var = jnp.ones((out_ch,), jnp.float32)
            # TODO(synk): reference uses training-mode BatchNorm1d (batch
            # statistics); here BN is folded as an inference-mode affine.
            scale = gamma / jnp.sqrt(run_var + eps)
            shift = beta + scale * (b - run_mean)
            self.weights.append(w * scale[:, None])          # fold scale into W
            self.shifts.append(shift.reshape(out_ch, 1))
            last = out_ch
        self.weights_bf16 = [w.astype(jnp.bfloat16) for w in self.weights]
        self._c_max = max(w.shape[0] for w in self.weights)

    def __call__(self, xyz1, xyz2, points1, points2):
        # PyTorch NCW layout end-to-end: xyz1 (B,3,N), xyz2 (B,3,S),
        # points1 (B,D1,N) or None, points2 (B,D2,S) -> (B,C_out,N).
        B, _, N = xyz1.shape
        S = xyz2.shape[2]
        D2 = points2.shape[1]
        has_p1 = points1 is not None
        D1 = points1.shape[1] if has_p1 else 0
        C_out = self.weights[-1].shape[0]
        num_layers = len(self.weights)

        # Host-side augmentation: fold -2 scale + both squared-norm
        # broadcast-adds of square_distance into one K=8 matmul, and hoist the
        # grid-invariant xyz2 transpose / row-sum out of the kernel.
        x1 = xyz1.astype(jnp.float32)
        x1sq = jnp.sum(x1 * x1, axis=1, keepdims=True)
        xyz1_aug = jnp.concatenate(
            [x1, jnp.ones((B, 1, N), jnp.float32), x1sq,
             jnp.zeros((B, 3, N), jnp.float32)], axis=1)              # (B, 8, N)
        x2 = jnp.transpose(xyz2.astype(jnp.float32), (0, 2, 1))       # (B, S, 3)
        x2sq = jnp.sum(x2 * x2, axis=2, keepdims=True)
        xyz2_aug = jnp.concatenate(
            [-2.0 * x2, x2sq, jnp.ones((B, S, 1), jnp.float32),
             jnp.zeros((B, S, 3), jnp.float32)], axis=2)              # (B, S, 8)

        vmem_limit = _vmem_limit_bytes()
        tile_n = _pick_tile_n(N, S, D1, D2, self._c_max, C_out, B, vmem_limit)
        n_pad = _round_up(N, tile_n)
        if n_pad != N:
            pad = n_pad - N
            xyz1_aug = jnp.pad(xyz1_aug, ((0, 0), (0, 0), (0, pad)))
            if has_p1:
                points1 = jnp.pad(points1, ((0, 0), (0, 0), (0, pad)))
        num_tiles = n_pad // tile_n

        inputs = [xyz1_aug, xyz2_aug, points2.astype(jnp.float32)]
        in_specs = [
            pl.BlockSpec((1, 8, tile_n), lambda b, t: (b, 0, t)),
            pl.BlockSpec((1, S, 8), lambda b, t: (b, 0, 0)),
            pl.BlockSpec((1, D2, S), lambda b, t: (b, 0, 0)),
        ]
        if has_p1:
            inputs.append(points1.astype(jnp.float32))
            in_specs.append(pl.BlockSpec((1, D1, tile_n), lambda b, t: (b, 0, t)))

        # MLP parameters (whole-array blocks, reused every grid step).  The
        # layer-0 weight is split across the [points1 | interpolated] boundary
        # so the concat never materializes.
        # TODO(synk): grid-invariant operands (xyz2_aug, points2, params) could
        # be single-buffered via pipeline_mode=pl.Buffered(1) to reclaim VMEM.
        w0 = self.weights_bf16[0]
        params = []
        if has_p1:
            params.append(w0[:, :D1])
        params += [w0[:, D1:], self.shifts[0]]
        for w, sh in zip(self.weights_bf16[1:], self.shifts[1:]):
            params += [w, sh]
        for p in params:
            in_specs.append(pl.BlockSpec(p.shape, lambda b, t: (0, 0)))
        inputs += params

        kernel = functools.partial(_fea_propagate_kernel,
                                   has_p1=has_p1, num_layers=num_layers)

        out = pl.pallas_call(
            kernel,
            out_shape=jax.ShapeDtypeStruct((B, C_out, n_pad), jnp.float32),
            grid=(B, num_tiles),
            in_specs=in_specs,
            out_specs=pl.BlockSpec((1, C_out, tile_n), lambda b, t: (b, 0, t)),
            compiler_params=pltpu.CompilerParams(
                dimension_semantics=("parallel", "parallel"),
                vmem_limit_bytes=vmem_limit),
        )(*inputs)
        if n_pad != N:
            out = out[:, :, :N]
        return out


# --------------------------------------------------------------------------
# Pure-JAX reference (same folded params, exact reciprocals, f32 matmuls)
# --------------------------------------------------------------------------
def ref_forward(mod, xyz1, xyz2, points1, points2):
    x1 = jnp.transpose(xyz1, (0, 2, 1))        # (B,N,3)
    x2 = jnp.transpose(xyz2, (0, 2, 1))        # (B,S,3)
    p2 = jnp.transpose(points2, (0, 2, 1))     # (B,S,D2)
    B, N, _ = x1.shape
    S = x2.shape[1]
    if S == 1:
        interp = jnp.broadcast_to(p2, (B, N, p2.shape[-1]))
    else:
        d = (-2.0 * jnp.einsum('bnc,bmc->bnm', x1, x2)
             + jnp.sum(x1 ** 2, -1)[..., None]
             + jnp.sum(x2 ** 2, -1)[:, None, :])
        k = min(3, S)
        idx = jnp.argsort(d, axis=-1)[..., :k]
        dsort = jnp.take_along_axis(d, idx, axis=-1)
        recip = 1.0 / (dsort + 1e-8)
        w = recip / jnp.sum(recip, -1, keepdims=True)
        gathered = jax.vmap(lambda pts, ids: pts[ids])(p2, idx)   # (B,N,k,D2)
        interp = jnp.sum(gathered * w[..., None], axis=2)
    if points1 is not None:
        x = jnp.concatenate([jnp.transpose(points1, (0, 2, 1)), interp], axis=-1)
    else:
        x = interp
    for wt, sh in zip(mod.weights, mod.shifts):
        x = jnp.maximum(x @ wt.T + sh[:, 0], 0.0)
    return jnp.transpose(x, (0, 2, 1))


if __name__ == "__main__":
    key = jax.random.PRNGKey(0)
    B, N, S = 2, 16, 8
    D1, D2 = 4, 8
    mlp_channels = [16, 32]

    k_xyz1, k_xyz2, k_p1, k_p2, k_params = jax.random.split(key, 5)
    xyz1 = jax.random.normal(k_xyz1, (B, 3, N), jnp.float32)
    xyz2 = jax.random.normal(k_xyz2, (B, 3, S), jnp.float32)
    points1 = jax.random.normal(k_p1, (B, D1, N), jnp.float32)
    points2 = jax.random.normal(k_p2, (B, D2, S), jnp.float32)

    module = FeaPropagate(in_channel=D1 + D2, mlp=mlp_channels, key=k_params)

    out = jax.block_until_ready(module(xyz1, xyz2, points1, points2))
    assert out.shape == (B, mlp_channels[-1], N), out.shape

    ref = jax.block_until_ready(ref_forward(module, xyz1, xyz2, points1, points2))
    err = float(jnp.max(jnp.abs(out - ref)))
    # tolerance accounts for bf16 MLP matmuls and EUP approximate reciprocals
    assert jnp.allclose(out, ref, rtol=5e-2, atol=5e-2), err

    print("KERNEL_OK")
</pallas_src>

<mosaic_0001>
module attributes {stable_mosaic.version = 11 : i64} {
  func.func @_fea_propagate_kernel(%arg0: i32, %arg1: i32, %arg2: memref<1x8x128xf32, #tpu.memory_space<vmem>>, %arg3: memref<1x8x8xf32, #tpu.memory_space<vmem>>, %arg4: memref<1x8x8xf32, #tpu.memory_space<vmem>>, %arg5: memref<1x4x128xf32, #tpu.memory_space<vmem>>, %arg6: memref<16x4xbf16, #tpu.memory_space<vmem>>, %arg7: memref<16x8xbf16, #tpu.memory_space<vmem>>, %arg8: memref<16x1xf32, #tpu.memory_space<vmem>>, %arg9: memref<32x16xbf16, #tpu.memory_space<vmem>>, %arg10: memref<32x1xf32, #tpu.memory_space<vmem>>, %arg11: memref<1x32x128xf32, #tpu.memory_space<vmem>>) attributes {dimension_semantics = [#tpu.dimension_semantics<parallel>, #tpu.dimension_semantics<parallel>], iteration_bounds = array<i64: 2, 1>, scalar_prefetch = 0 : i64, scratch_operands = 0 : i64, tpu.core_type = #tpu.core_type<tc>, window_params = [{transform_indices = @transform_0, window_bounds = array<i64: 1, 8, 128>}, {transform_indices = @transform_1, window_bounds = array<i64: 1, 8, 8>}, {transform_indices = @transform_2, window_bounds = array<i64: 1, 8, 8>}, {transform_indices = @transform_3, window_bounds = array<i64: 1, 4, 128>}, {pipeline_mode = #tpu.pipeline_mode<synchronous>, transform_indices = @transform_4, window_bounds = array<i64: 16, 4>}, {pipeline_mode = #tpu.pipeline_mode<synchronous>, transform_indices = @transform_5, window_bounds = array<i64: 16, 8>}, {pipeline_mode = #tpu.pipeline_mode<synchronous>, transform_indices = @transform_6, window_bounds = array<i64: 16, 1>}, {pipeline_mode = #tpu.pipeline_mode<synchronous>, transform_indices = @transform_7, window_bounds = array<i64: 32, 16>}, {pipeline_mode = #tpu.pipeline_mode<synchronous>, transform_indices = @transform_8, window_bounds = array<i64: 32, 1>}, {transform_indices = @transform_9, window_bounds = array<i64: 1, 32, 128>}]} {
    %c0 = arith.constant 0 : index
    %c0_0 = arith.constant 0 : index
    %c0_1 = arith.constant 0 : index
    %0 = vector.load %arg4[%c0, %c0_0, %c0_1] : memref<1x8x8xf32, #tpu.memory_space<vmem>>, vector<1x8x8xf32>
    %1 = vector.shape_cast %0 : vector<1x8x8xf32> to vector<8x8xf32>
    %c0_2 = arith.constant 0 : index
    %c0_3 = arith.constant 0 : index
    %c0_4 = arith.constant 0 : index
    %2 = vector.load %arg2[%c0_2, %c0_3, %c0_4] : memref<1x8x128xf32, #tpu.memory_space<vmem>>, vector<1x8x128xf32>
    %3 = vector.shape_cast %2 : vector<1x8x128xf32> to vector<8x128xf32>
    %c0_5 = arith.constant 0 : index
    %c0_6 = arith.constant 0 : index
    %c0_7 = arith.constant 0 : index
    %4 = vector.load %arg3[%c0_5, %c0_6, %c0_7] : memref<1x8x8xf32, #tpu.memory_space<vmem>>, vector<1x8x8xf32>
    %5 = vector.shape_cast %4 : vector<1x8x8xf32> to vector<8x8xf32>
    %cst = arith.constant dense<0.000000e+00> : vector<8x128xf32>
    %6 = tpu.matmul %5, %3, %cst {dimension_numbers = #tpu.dot_dimension_numbers<[1], [0], [0], [1], [0, 0, 1, 1], [], []>} : vector<8x8xf32>, vector<8x128xf32>, vector<8x128xf32> -> vector<8x128xf32>
    %cst_8 = arith.constant 0.000000e+00 : f32
    %7 = vector.broadcast %cst_8 : f32 to vector<8x128xf32>
    %cst_9 = arith.constant 0.000000e+00 : f32
    %8 = vector.broadcast %cst_9 : f32 to vector<1x128xf32>
    %cst_10 = arith.constant dense<0x7F800000> : vector<128xf32>
    %9 = vector.multi_reduction <minimumf>, %6, %cst_10 [0] : vector<8x128xf32> to vector<128xf32>
    %10 = vector.shape_cast %9 : vector<128xf32> to vector<1x128xf32>
    %11 = vector.broadcast %10 : vector<1x128xf32> to vector<8x128xf32>
    %12 = arith.cmpf oeq, %6, %11 : vector<8x128xf32>
    %cst_11 = arith.constant 9.99999993E-9 : f32
    %13 = vector.broadcast %cst_11 : f32 to vector<1x128xf32>
    %14 = arith.addf %10, %13 : vector<1x128xf32>
    %15 = tpu.reciprocal %14 {approx = true} : vector<1x128xf32> -> vector<1x128xf32>
    %cst_12 = arith.constant 0.000000e+00 : f32
    %16 = vector.shape_cast %15 : vector<1x128xf32> to vector<1x128xf32>
    %17 = vector.broadcast %16 : vector<1x128xf32> to vector<8x128xf32>
    %18 = vector.broadcast %cst_12 : f32 to vector<8x128xf32>
    %19 = arith.select %12, %17, %18 : vector<8x128xi1>, vector<8x128xf32>
    %20 = arith.addf %7, %19 : vector<8x128xf32>
    %21 = arith.addf %8, %15 : vector<1x128xf32>
    %cst_13 = arith.constant 1.000000e+30 : f32
    %22 = vector.broadcast %cst_13 : f32 to vector<8x128xf32>
    %23 = arith.select %12, %22, %6 : vector<8x128xi1>, vector<8x128xf32>
    %cst_14 = arith.constant dense<0x7F800000> : vector<128xf32>
    %24 = vector.multi_reduction <minimumf>, %23, %cst_14 [0] : vector<8x128xf32> to vector<128xf32>
    %25 = vector.shape_cast %24 : vector<128xf32> to vector<1x128xf32>
    %26 = vector.broadcast %25 : vector<1x128xf32> to vector<8x128xf32>
    %27 = arith.cmpf oeq, %23, %26 : vector<8x128xf32>
    %cst_15 = arith.constant 9.99999993E-9 : f32
    %28 = vector.broadcast %cst_15 : f32 to vector<1x128xf32>
    %29 = arith.addf %25, %28 : vector<1x128xf32>
    %30 = tpu.reciprocal %29 {approx = true} : vector<1x128xf32> -> vector<1x128xf32>
    %cst_16 = arith.constant 0.000000e+00 : f32
    %31 = vector.shape_cast %30 : vector<1x128xf32> to vector<1x128xf32>
    %32 = vector.broadcast %31 : vector<1x128xf32> to vector<8x128xf32>
    %33 = vector.broadcast %cst_16 : f32 to vector<8x128xf32>
    %34 = arith.select %27, %32, %33 : vector<8x128xi1>, vector<8x128xf32>
    %35 = arith.addf %20, %34 : vector<8x128xf32>
    %36 = arith.addf %21, %30 : vector<1x128xf32>
    %cst_17 = arith.constant 1.000000e+30 : f32
    %37 = vector.broadcast %cst_17 : f32 to vector<8x128xf32>
    %38 = arith.select %27, %37, %23 : vector<8x128xi1>, vector<8x128xf32>
    %cst_18 = arith.constant dense<0x7F800000> : vector<128xf32>
    %39 = vector.multi_reduction <minimumf>, %38, %cst_18 [0] : vector<8x128xf32> to vector<128xf32>
    %40 = vector.shape_cast %39 : vector<128xf32> to vector<1x128xf32>
    %41 = vector.broadcast %40 : vector<1x128xf32> to vector<8x128xf32>
    %42 = arith.cmpf oeq, %38, %41 : vector<8x128xf32>
    %cst_19 = arith.constant 9.99999993E-9 : f32
    %43 = vector.broadcast %cst_19 : f32 to vector<1x128xf32>
    %44 = arith.addf %40, %43 : vector<1x128xf32>
    %45 = tpu.reciprocal %44 {approx = true} : vector<1x128xf32> -> vector<1x128xf32>
    %cst_20 = arith.constant 0.000000e+00 : f32
    %46 = vector.shape_cast %45 : vector<1x128xf32> to vector<1x128xf32>
    %47 = vector.broadcast %46 : vector<1x128xf32> to vector<8x128xf32>
    %48 = vector.broadcast %cst_20 : f32 to vector<8x128xf32>
    %49 = arith.select %42, %47, %48 : vector<8x128xi1>, vector<8x128xf32>
    %50 = arith.addf %35, %49 : vector<8x128xf32>
    %51 = arith.addf %36, %45 : vector<1x128xf32>
    %cst_21 = arith.constant dense<0.000000e+00> : vector<8x128xf32>
    %52 = tpu.matmul %1, %50, %cst_21 {dimension_numbers = #tpu.dot_dimension_numbers<[1], [0], [0], [1], [0, 0, 1, 1], [], []>} : vector<8x8xf32>, vector<8x128xf32>, vector<8x128xf32> -> vector<8x128xf32>
    %53 = tpu.reciprocal %51 {approx = true} : vector<1x128xf32> -> vector<1x128xf32>
    %54 = vector.broadcast %53 : vector<1x128xf32> to vector<8x128xf32>
    %55 = arith.mulf %52, %54 : vector<8x128xf32>
    %c0_22 = arith.constant 0 : index
    %c0_23 = arith.constant 0 : index
    %56 = vector.load %arg6[%c0_22, %c0_23] : memref<16x4xbf16, #tpu.memory_space<vmem>>, vector<16x4xbf16>
    %c0_24 = arith.constant 0 : index
    %c0_25 = arith.constant 0 : index
    %57 = vector.load %arg7[%c0_24, %c0_25] : memref<16x8xbf16, #tpu.memory_space<vmem>>, vector<16x8xbf16>
    %c0_26 = arith.constant 0 : index
    %c0_27 = arith.constant 0 : index
    %58 = vector.load %arg8[%c0_26, %c0_27] : memref<16x1xf32, #tpu.memory_space<vmem>>, vector<16x1xf32>
    %59 = arith.truncf %55 : vector<8x128xf32> to vector<8x128xbf16>
    %cst_28 = arith.constant dense<0.000000e+00> : vector<16x128xf32>
    %60 = tpu.matmul %57, %59, %cst_28 {dimension_numbers = #tpu.dot_dimension_numbers<[1], [0], [0], [1], [0, 0, 1, 1], [], []>} : vector<16x8xbf16>, vector<8x128xbf16>, vector<16x128xf32> -> vector<16x128xf32>
    %c0_29 = arith.constant 0 : index
    %c0_30 = arith.constant 0 : index
    %c0_31 = arith.constant 0 : index
    %61 = vector.load %arg5[%c0_29, %c0_30, %c0_31] : memref<1x4x128xf32, #tpu.memory_space<vmem>>, vector<1x4x128xf32>
    %62 = vector.shape_cast %61 : vector<1x4x128xf32> to vector<4x128xf32>
    %63 = arith.truncf %62 : vector<4x128xf32> to vector<4x128xbf16>
    %cst_32 = arith.constant dense<0.000000e+00> : vector<16x128xf32>
    %64 = tpu.matmul %56, %63, %cst_32 {dimension_numbers = #tpu.dot_dimension_numbers<[1], [0], [0], [1], [0, 0, 1, 1], [], []>} : vector<16x4xbf16>, vector<4x128xbf16>, vector<16x128xf32> -> vector<16x128xf32>
    %65 = arith.addf %60, %64 : vector<16x128xf32>
    %66 = vector.broadcast %58 : vector<16x1xf32> to vector<16x128xf32>
    %67 = arith.addf %65, %66 : vector<16x128xf32>
    %cst_33 = arith.constant 0.000000e+00 : f32
    %68 = vector.broadcast %cst_33 : f32 to vector<16x128xf32>
    %69 = arith.maximumf %67, %68 : vector<16x128xf32>
    %c0_34 = arith.constant 0 : index
    %c0_35 = arith.constant 0 : index
    %70 = vector.load %arg9[%c0_34, %c0_35] : memref<32x16xbf16, #tpu.memory_space<vmem>>, vector<32x16xbf16>
    %c0_36 = arith.constant 0 : index
    %c0_37 = arith.constant 0 : index
    %71 = vector.load %arg10[%c0_36, %c0_37] : memref<32x1xf32, #tpu.memory_space<vmem>>, vector<32x1xf32>
    %72 = arith.truncf %69 : vector<16x128xf32> to vector<16x128xbf16>
    %cst_38 = arith.constant dense<0.000000e+00> : vector<32x128xf32>
    %73 = tpu.matmul %70, %72, %cst_38 {dimension_numbers = #tpu.dot_dimension_numbers<[1], [0], [0], [1], [0, 0, 1, 1], [], []>} : vector<32x16xbf16>, vector<16x128xbf16>, vector<32x128xf32> -> vector<32x128xf32>
    %74 = vector.broadcast %71 : vector<32x1xf32> to vector<32x128xf32>
    %75 = arith.addf %73, %74 : vector<32x128xf32>
    %cst_39 = arith.constant 0.000000e+00 : f32
    %76 = vector.broadcast %cst_39 : f32 to vector<32x128xf32>
    %77 = arith.maximumf %75, %76 : vector<32x128xf32>
    %c0_40 = arith.constant 0 : index
    %c0_41 = arith.constant 0 : index
    %c0_42 = arith.constant 0 : index
    %78 = vector.load %arg11[%c0_40, %c0_41, %c0_42] : memref<1x32x128xf32, #tpu.memory_space<vmem>>, vector<1x32x128xf32>
    %79 = vector.shape_cast %78 : vector<1x32x128xf32> to vector<32x128xf32>
    %80 = vector.shape_cast %77 : vector<32x128xf32> to vector<1x32x128xf32>
    tpu.vector_store %arg11[%c0_40, %c0_41, %c0_42], %80 {strides = array<i32>} : memref<1x32x128xf32, #tpu.memory_space<vmem>>, vector<1x32x128xf32>,
    return
  }
  func.func @transform_0(%arg0: i32, %arg1: i32) -> (i32, i32, i32) {
    %c0_i32 = arith.constant 0 : i32
    %c0_i32_0 = arith.constant 0 : i32
    return %arg0, %c0_i32, %arg1 : i32, i32, i32
  }
  func.func @transform_1(%arg0: i32, %arg1: i32) -> (i32, i32, i32) {
    %c0_i32 = arith.constant 0 : i32
    %c0_i32_0 = arith.constant 0 : i32
    %c0_i32_1 = arith.constant 0 : i32
    return %arg0, %c0_i32, %c0_i32_0 : i32, i32, i32
  }
  func.func @transform_2(%arg0: i32, %arg1: i32) -> (i32, i32, i32) {
    %c0_i32 = arith.constant 0 : i32
    %c0_i32_0 = arith.constant 0 : i32
    %c0_i32_1 = arith.constant 0 : i32
    return %arg0, %c0_i32, %c0_i32_0 : i32, i32, i32
  }
  func.func @transform_3(%arg0: i32, %arg1: i32) -> (i32, i32, i32) {
    %c0_i32 = arith.constant 0 : i32
    %c0_i32_0 = arith.constant 0 : i32
    return %arg0, %c0_i32, %arg1 : i32, i32, i32
  }
  func.func @transform_4(%arg0: i32, %arg1: i32) -> (i32, i32) {
    %c0_i32 = arith.constant 0 : i32
    %c0_i32_0 = arith.constant 0 : i32
    %c0_i32_1 = arith.constant 0 : i32
    return %c0_i32, %c0_i32_0 : i32, i32
  }
  func.func @transform_5(%arg0: i32, %arg1: i32) -> (i32, i32) {
    %c0_i32 = arith.constant 0 : i32
    %c0_i32_0 = arith.constant 0 : i32
    %c0_i32_1 = arith.constant 0 : i32
    return %c0_i32, %c0_i32_0 : i32, i32
  }
  func.func @transform_6(%arg0: i32, %arg1: i32) -> (i32, i32) {
    %c0_i32 = arith.constant 0 : i32
    %c0_i32_0 = arith.constant 0 : i32
    %c0_i32_1 = arith.constant 0 : i32
    return %c0_i32, %c0_i32_0 : i32, i32
  }
  func.func @transform_7(%arg0: i32, %arg1: i32) -> (i32, i32) {
    %c0_i32 = arith.constant 0 : i32
    %c0_i32_0 = arith.constant 0 : i32
    %c0_i32_1 = arith.constant 0 : i32
    return %c0_i32, %c0_i32_0 : i32, i32
  }
  func.func @transform_8(%arg0: i32, %arg1: i32) -> (i32, i32) {
    %c0_i32 = arith.constant 0 : i32
    %c0_i32_0 = arith.constant 0 : i32
    %c0_i32_1 = arith.constant 0 : i32
    return %c0_i32, %c0_i32_0 : i32, i32
  }
  func.func @transform_9(%arg0: i32, %arg1: i32) -> (i32, i32, i32) {
    %c0_i32 = arith.constant 0 : i32
    %c0_i32_0 = arith.constant 0 : i32
    return %arg0, %c0_i32, %arg1 : i32, i32, i32
  }
}

</mosaic_0001>

<bundles_post_ra>
// kernel: tpu_custom_call.1
= control target key start
LH: loop header
LB: loop body
LE: loop exit
PB: predicated region body
PF: predicated region fallthrough
CT: control target
= control target key end

     0   :  { %14 = vsyncpa [#allocation3], 0  ;;  %s1179_s0 = inlined_call_operand.vmem [shape: f32[2,8,128], index: 0, kind: input, shape index: {}]   ;;  %s1180_s1 = inlined_call_operand.vmem [shape: f32[2,8,8], index: 1, kind: input, shape index: {}]   ;;  %s1181_s2 = inlined_call_operand.vmem [shape: f32[2,8,8], index: 2, kind: input, shape index: {}]   ;;  %s1182_s3 = inlined_call_operand.vmem [shape: f32[2,4,128], index: 3, kind: input, shape index: {}]   ;;  %s1183_s4 = inlined_call_operand.vmem [shape: bf16[16,4], index: 4, kind: input, shape index: {}]   ;;  %s1184_s5 = inlined_call_operand.vmem [shape: bf16[16,8], index: 5, kind: input, shape index: {}]   ;;  %s1185_s6 = inlined_call_operand.vmem [shape: f32[16,1], index: 6, kind: input, shape index: {}]   ;;  %s1186_s7 = inlined_call_operand.vmem [shape: bf16[32,16], index: 7, kind: input, shape index: {}]   ;;  %s1187_s8 = inlined_call_operand.vmem [shape: f32[32,1], index: 8, kind: input, shape index: {}]   ;;  %s1188_s9 = inlined_call_operand.hbm [shape: f32[2,32,128], index: 9, kind: output, shape index: {}]  }
   0x1   :  { %16 = vsyncpa [#allocation3 + $0x1], 0  ;;  %s1031_s30 = smov 0   ;;  %s1033_s10 = smov 0  }
   0x2   :  { %s1035_s11 = smov 0   ;;  %s1037_s12 = smov 0  }
   0x3   :  { %s1039_s13 = smov 0   ;;  %s1041_s14 = smov 0  }
   0x4 LB: > { %s786_s15 = sadd.s32 4294967295, %s976_s14   ;;  %s787_s16 = sadd.s32 4294967294, %s976_s14   ;;  %s976_s14 = sphi %s1041_s14, %s22_s14   ;;  %s972_s13 = sphi %s1039_s13, %s1195_s13   ;;  %s968_s12 = sphi %s1037_s12, %s1194_s12   ;;  %s964_s11 = sphi %s1035_s11, %s1193_s11   ;;  %s960_s10 = sphi %s1033_s10, %s1192_s10   ;;  %s956_s30 = sphi %s1031_s30, %s1191_s30  }
   0x5   : > { %s34_s17 = sadd.s32 1, %s972_s13  ;;  %s256_s18 = sadd.s32 1, %s964_s11 }
   0x6   : > { %p36_p0 = scmp.ge.s32.totalorder %s34_s17, 2  ;;  %p266_p1 = scmp.ne.s32.totalorder %s964_s11, %s960_s10 }
   0x7   : > { %p267_p2 = scmp.eq.s32.totalorder %s786_s15, 1  ;;  %p272_p3 = scmp.ne.s32.totalorder %s960_s10, %s956_s30 }
   0x8   : > { %s1197_s17 = smov (%p36_p0, %s34_s17), 0  ;;  %p273_p5 = scmp.eq.s32.totalorder %s787_s16, 1 }
   0x9   : > { %p1071_p4 = por %p267_p2, %p266_p1  ;;  %s251_s20 = ssub.s32 %s972_s13, %s1197_s17 }
   0xa   : > { %p790_p6 = scmp.ge.s32.totalorder %s976_s14, 1  ;;  %p254_p7 = scmp.eq.s32.totalorder %s251_s20, 0 }
   0xb   : > { %p1078_p8 = por %p273_p5, %p272_p3  ;;  %p340_p9 = scmp.lt.s32.totalorder %s976_s14, 3 }
   0xc   : > { %s1084_s22 = scalar_select %p254_p7, %s964_s11, %s256_s18  }
   0xd   : > { %p341_p10 = pnand %p790_p6, %p340_p9 }
   0xe   : > { %p393_p11 = scmp.lt.s32.totalorder (!%p341_p10), %s968_s12, 1  ;;  %s390_s26 = sand.u32 (!%p341_p10), 1, %s960_s10  }
   0xf   : > { %344 = sbr.rel (%p341_p10) target bundleno = 633 (0x279), region = 56  ;;  %s827_s28 = sshll.u32 (!%p341_p10), %s968_s12, 5 }
  0x14   : > { %s394_s23 = scalar_select %p393_p11, %s968_s12, 1  ;;  %vm419_vm0 = vcmask 64512   ;;  %vm524_vm2 = vcmask 1041408   ;;  %v823_v40 = vld [vmem:[%s1183_s4] sm:$0xff]  ;;  %vm520_vm5 = vcmask 31744   ;;  %v978_v42 = vmov 0  }
  0x15   : > { %v510_v41 = vld [vmem:[%s1185_s6] sm:$0xff]  ;;  %887 = vset.pattern.permute.xlu0 %v978_v42  ;;  %888 = vset.pattern.permute.xlu1 %v978_v42  ;;  %v511_v43 = vld [vmem:[%s1185_s6 + $0x8] sm:$0xff]  ;;  %vm550_vm6 = vcmask 1043456   ;;  %v588_v51 = vld [vmem:[%s1187_s8 + $0x10] sm:$0xff]  ;;  %vm621_vm7 = vcmask 130048   ;;  %s656_s12 = scalar_lea.sflag [#allocation3], %s390_s26 }
  0x16   : > { %s1088_s24 = sshll.u32 %s394_s23, 3  ;;  %s795_s16 = sshll.u32 %s394_s23, 2  ;;  %570 = vperm.xlu0 %887, %v510_v41   ;;  %889 = vset.pattern.permute.xlu2 %v978_v42  ;;  %v824_v49 = vld [vmem:[%s1184_s5] sm:$0xff]  ;;  %v587_v52 = vld [vmem:[%s1187_s8 + $0x8] sm:$0xff]  ;;  %v589_v53 = vld [vmem:[%s1187_s8 + $0x18] sm:$0xff] }
  0x17   : > { %s399_s27 = scalar_lea.vmem %s1179_s0, %s1088_s24  ;;  %s403_s15 = scalar_lea.vmem %s1180_s1, %s1088_s24  ;;  %v586_v50 = vld [vmem:[%s1187_s8] sm:$0xff]  ;;  %603 = vperm.xlu2 %889, %v588_v51  }
  0x18   : > { %v417_v0 = vld [vmem:[%s399_s27] sm:$0xff]  ;;  %s414_s25 = scalar_lea.vmem %s1182_s3, %s795_s16  ;;  %s407_s27 = scalar_lea.vmem %s1181_s2, %s1088_s24  ;;  %593 = vperm.xlu1 %888, %v586_v50  }
  0x19   : > { %v418_v1 = vld [vmem:[%s403_s15] sm:$0xff]  ;;  %438 = vmatpush.msra.mxu0 %v417_v0  ;;  %s668_s24 = scalar_lea.hbm %s1188_s9, %s827_s28  ;;  %s918_s15 = scalar_lea.hbm %s1188_s9, 64 }
  0x1a   : > { %796 = vmatmul.msk.f32.vlgmr.msra.gmra.mxu0 %vm419_vm0, %v418_v1  ;;  %v513_v14 = vld [vmem:[%s414_s25] sm:$0xf]  ;;  %s671_s20 = sshll.u32 %s668_s24, 4  ;;  %s672_s20 = int_to_ptr.hbm [resolvable:$true] %s671_s20 }
  0x1b   : > { %v514_v16 = vpack.c.bf16 %v513_v14, %v513_v14  ;;  %v416_v39 = vld [vmem:[%s407_s27] sm:$0xff]  ;;  %s791_s27 = sshll.u32 %s390_s26, 5  ;;  %s912_s25 = sshra.s32 %s672_s20, 4  ;;  %s913_s25 = int_to_ptr.hbm [resolvable:$true] %s912_s25 }
  0x1c   : > { %s392_s29 = scalar_lea.vmem [#allocation2], %s791_s27  ;;  %s914_s23 = scalar_lea.hbm %s913_s25, 32 }
  0x1d   : > { %v526_v19 = vsel %vm524_vm2, %v514_v16, 0  ;;  %s669_s18 = sshll.u32 %s392_s29, 4  ;;  %p915_p12 = scmp.ne.s32.totalorder %s913_s25, %s914_s23  ;;  %s670_s18 = int_to_ptr.vmem [resolvable:$true] %s669_s18 }
  0x1e   : > { %535 = vmatpush.bf16.msra.mxu2 %v526_v19  ;;  %575 = vperm.xlu0 %887, %v511_v43   ;;  %p919_p1 = scmp.lt.s32.totalorder %s913_s25, %s1188_s9  ;;  %p920_p2 = scmp.lt.s32.totalorder %s918_s15, %s914_s23 }
  0x1f   : > { %608 = vperm.xlu2 %889, %v589_v53   ;;  %p916_p13 = pnand %p915_p12, %p1071_p4 }
  0x20   : > { %598 = vperm.xlu1 %888, %v587_v52   ;;  %p921_p3 = por %p920_p2, %p919_p1 }
  0x21   : > { %802 = vmatmul.msk.bf16.vlgmr.msra.gmra.mxu2 %vm520_vm5, %v823_v40  ;;  %p917_p0 = pneg %p916_p13 }
  0x23   : > { %p922_p5 = pnand %p921_p3, %p917_p0 }
  0x88   : > { %v571_v55 = vpop.permute.xlu0 %570 }
  0x90   : > { %v576_v62 = vpop.permute.xlu0 %575 }
  0x97   : > { %v440_v2 = vpop.f32.mrf.mxu0 }
  0x98   : > { %v443_v3 = vrot.slane %v440_v2, 4 }
  0x9a   : > { %v444_v4 = vmin.f32 %v440_v2, %v443_v3  ;;  %v825_v3 = vld [vmem:[%s1186_s7] sm:$0xff] }
  0x9c   : > { %v445_v5 = vrot.slane %v444_v4, 2 }
  0x9e   : > { %v446_v6 = vmin.f32 %v444_v4, %v445_v5  ;;  %v826_v4 = vld [vmem:[%s1186_s7 + $0x8] sm:$0xff]  ;;  %v604_v5 = vpop.permute.xlu2 %603 }
  0xa0   : > { %v447_v7 = vrot.slane %v446_v6, 1 }
  0xa2   : > { %v448_v8 = vmin.f32 %v446_v6, %v447_v7  ;;  %v594_v6 = vpop.permute.xlu1 %593 }
  0xa4   : > { %vm449_vm1 = vcmp.eq.f32.partialorder %v440_v2, %v448_v8  ;;  %v450_v17 = vadd.f32 1e-08, %v448_v8  ;;  %v537_v54 = vpop.f32.mrf.mxu2 }
  0xa5   : > { %v455_v9 = vsel %vm449_vm1, 1e+30, %v440_v2 }
  0xa6   : > { %v456_v10 = vrot.slane %v455_v9, 4  ;;  %890 = vrcp.f32 %v450_v17 }
  0xa8   : > { %v457_v11 = vmin.f32 %v455_v9, %v456_v10 }
  0xaa   : > { %v458_v12 = vrot.slane %v457_v11, 2  ;;  %v599_v14 = vpop.permute.xlu1 %598 }
  0xac   : > { %v459_v13 = vmin.f32 %v457_v11, %v458_v12  ;;  %v891_v25 = vpop.eup %890  ;;  %v539_v58 = vpop.f32.mrf.mxu2 }
  0xad   : > { %v452_v33 = vsel %vm449_vm1, %v891_v25, 0.0 }
  0xae   : > { %v460_v15 = vrot.slane %v459_v13, 1 }
  0xb0   : > { %v461_v18 = vmin.f32 %v459_v13, %v460_v15  ;;  %v609_v13 = vpop.permute.xlu2 %608 }
  0xb2   : > { %vm462_vm3 = vcmp.eq.f32.partialorder %v455_v9, %v461_v18  ;;  %v463_v20 = vadd.f32 1e-08, %v461_v18 }
  0xb3   : > { %v468_v21 = vsel %vm462_vm3, 1e+30, %v455_v9 }
  0xb4   : > { %892 = vrcp.f32 %v463_v20  ;;  %v469_v22 = vrot.slane %v468_v21, 4 }
  0xb6   : > { %v470_v23 = vmin.f32 %v468_v21, %v469_v22 }
  0xb8   : > { %v471_v24 = vrot.slane %v470_v23, 2 }
  0xba   : > { %v893_v26 = vpop.eup %892  ;;  %v472_v27 = vmin.f32 %v470_v23, %v471_v24 }
  0xbb   : > { %v467_v28 = vadd.f32 %v893_v26, %v891_v25  ;;  %v465_v32 = vsel %vm462_vm3, %v893_v26, 0.0 }
  0xbc   : > { %v473_v29 = vrot.slane %v472_v27, 1  ;;  %v466_v35 = vadd.f32 %v465_v32, %v452_v33 }
  0xbe   : > { %v474_v30 = vmin.f32 %v472_v27, %v473_v29 }
  0xc0   : > { %v476_v31 = vadd.f32 1e-08, %v474_v30  ;;  %vm475_vm4 = vcmp.eq.f32.partialorder %v468_v21, %v474_v30 }
  0xc2   : > { %894 = vrcp.f32 %v476_v31 }
  0xc8   : > { %v895_v34 = vpop.eup %894 }
  0xc9   : > { %v478_v36 = vsel %vm475_vm4, %v895_v34, 0.0  ;;  %v480_v37 = vadd.f32 %v895_v34, %v467_v28 }
  0xca   : > { %v479_v38 = vadd.f32 %v478_v36, %v466_v35 }
  0xcb   : > { %896 = vrcp.f32 %v480_v37 }
  0xcc   : > { %499 = vmatpush.msra.mxu1 %v479_v38 }
  0xcd   : > { %797 = vmatmul.msk.f32.vlgmr.msra.gmra.mxu1 %vm419_vm0, %v416_v39 }
  0xd1   : > { %v897_v44 = vpop.eup %896 }
 0x14a   : > { %v501_v45 = vpop.f32.mrf.mxu1 }
 0x14b   : > { %v505_v46 = vmul.f32 %v897_v44, %v501_v45 }
 0x14d   : > { %v512_v47 = vpack.c.bf16 %v505_v46, %v505_v46 }
 0x14f   : > { %v552_v48 = vsel %vm550_vm6, %v512_v47, 0 }
 0x150   : > { %561 = vmatpush.bf16.msra.mxu3 %v552_v48 }
 0x153   : > { %807 = vmatmul.msk.bf16.vlgmr.msra.gmra.mxu3 %vm419_vm0, %v824_v49 }
 0x1d6   : > { %v563_v56 = vpop.f32.mrf.mxu3 }
 0x1d7   : > { %v564_v57 = vadd.f32 %v563_v56, %v537_v54 }
 0x1d9   : > { %v578_v60 = vadd.f32 %v571_v55, %v564_v57 }
 0x1db   : > { %v580_v0 = vmax.f32 %v578_v60, 0.0 }
 0x1de   : > { %v565_v59 = vpop.f32.mrf.mxu3 }
 0x1df   : > { %v566_v61 = vadd.f32 %v565_v59, %v539_v58 }
 0x1e1   : > { %v579_v63 = vadd.f32 %v576_v62, %v566_v61 }
 0x1e3   : > { %v581_v1 = vmax.f32 %v579_v63, 0.0 }
 0x1e5   : > { %v590_v2 = vpack.c.bf16 %v581_v1, %v580_v0 }
 0x1e7   : > { %635 = vmatpush.bf16.msrb.mxu0 %v590_v2  ;;  %828 = vmatpush.bf16.msrb.mxu1 %v590_v2 }
 0x1ea   : > { %816 = vmatmul.msk.bf16.vlgmr.msrb.gmra.mxu0 %vm621_vm7, %v825_v3  ;;  %817 = vmatmul.msk.bf16.vlgmr.msrb.gmra.mxu1 %vm621_vm7, %v826_v4 }
 0x267   : > { %v637_v7 = vpop.f32.mrf.mxu0  ;;  %v642_v8 = vpop.f32.mrf.mxu1 }
 0x268   : > { %v638_v9 = vadd.f32 %v637_v7, %v594_v6  ;;  %v643_v10 = vadd.f32 %v642_v8, %v604_v5 }
 0x26a   : > { %v647_v11 = vmax.f32 %v638_v9, 0.0  ;;  %v649_v12 = vmax.f32 %v643_v10, 0.0 }
 0x26c   : > { %651 = vst [vmem:[%s392_s29] sm:$0xff] %v647_v11 }
 0x26d   : > { %653 = vst [vmem:[%s392_s29 + $0x10] sm:$0xff] %v649_v12 }
 0x26f   : > { %v639_v15 = vpop.f32.mrf.mxu0  ;;  %v644_v16 = vpop.f32.mrf.mxu1 }
 0x270   : > { %v640_v17 = vadd.f32 %v639_v15, %v599_v14  ;;  %v645_v18 = vadd.f32 %v644_v16, %v609_v13 }
 0x272   : > { %v648_v19 = vmax.f32 %v640_v17, 0.0  ;;  %v650_v20 = vmax.f32 %v645_v18, 0.0 }
 0x274   : > { %652 = vst [vmem:[%s392_s29 + $0x8] sm:$0xff] %v648_v19 }
 0x275   : > { %654 = vst [vmem:[%s392_s29 + $0x18] sm:$0xff] %v650_v20 }
 0x276   : > { %925 = shalt.err (!%p922_p5)
}
 0x277   : > { %s979_s26 = smov 128   ;;  %s980_s29 = smov 8  }
 0x278   : > { %829 = dma.vmem_to_hbm [thread:$0]  (%p1071_p4), %s670_s18, 512, %s672_s20, %s656_s12, %s979_s26, %s979_s26, %s980_s29  }
 0x279 PF: > { %p835_p6 = scmp.ge.s32.totalorder %s976_s14, 2  ;;  %s686_s27 = sand.u32 1, %s956_s30  }
 0x27a   : > { %s687_s28 = scalar_lea.sflag [#allocation3], %s686_s27 }
 0x27b   : > { %p832_p7 = pnand %p835_p6, %p1078_p8 }
 0x27d   : > { %p833_p9 = pneg %p832_p7 }
 0x27f   : > { %951 = dma.done.wait (%p833_p9), %s687_s28, 512  }
 0x280   : > { %953 = vsyncadd (%p833_p9), %s687_s28, 4294966784  ;;  %s22_s14 = sadd.s32 1, %s976_s14   ;;  %s1191_s30 = smov %s960_s10 }
 0x281   : > { %p19_p10 = scmp.ge.s32.totalorder %s22_s14, 4   ;;  %s1192_s10 = smov %s964_s11 }
 0x282   : > { %s1193_s11 = smov %s1084_s22  ;;  %s1194_s12 = smov %s972_s13 }
 0x283   : > { %s1195_s13 = smov %s1197_s17  ;;  %21 = sbr.rel (!%p19_p10) target bundleno = 4 (0x4), region = 100 }
 0x288   :  { %693 = vsyncpa [#allocation3], 1 }
 0x289   :  { %695 = vsyncpa [#allocation3 + $0x1], 1 }

</bundles_post_ra>
